<compile_context>
chip_gen: v7x
topology: tpu7x:2x2x1
jax: 0.10.0
libtpu: 0.0.40
codegen_flags: <defaults>
</compile_context>

<pallas_src>
import math

import jax
import jax.numpy as jnp
from jax.experimental import pallas as pl
from jax.experimental.pallas import tpu as pltpu


PAST_SIZE = 3
IN_FEATURES = PAST_SIZE + 1          # 4
OUT_FEATURES = 1

_LANE = 128
_ROW_PACK = _LANE // IN_FEATURES     # 32 batch rows packed per 128-lane row
_PACKED_WIDTH = _ROW_PACK * IN_FEATURES  # 128
_MAX_BLOCK_ROWS = 4096               # packed rows / grid step = 131072 batch rows
_MIN_GRID_STEPS = 4                  # keep >=4 steps so v7x can shard across 2 TCs
_FAST_PATH_MAX_BATCH = 8192          # below this, launch/tiling overhead dominates


def _round_up(n, m):
    return ((n + m - 1) // m) * m


def _linear_kernel(x_ref, w_ref, b_ref, o_ref):
    # x_ref: VMEM (tbr, 128) f32 -- 32 batch rows x 4 features interleaved per row
    # w_ref: VMEM (128, 32) f32  -- block-diagonal weights (constant block, DMA'd once)
    # b_ref: SMEM (1,)  f32
    # o_ref: VMEM (tbr, 32) f32  -- 32 outputs per packed row
    o_ref[...] = (
        jnp.dot(
            x_ref[...],
            w_ref[...],
            preferred_element_type=jnp.float32,
            precision=jax.lax.Precision.HIGHEST,  # keep full f32 accuracy on the MXU
        )
        + b_ref[0]
    )


def controls_predictor_forward(x, weight, bias, *, block_rows=_MAX_BLOCK_ROWS,
                               use_kernel=None):
    """Pallas equivalent of ControlsPredictor.forward.

    x:      (..., IN_FEATURES) float32
    weight: (OUT_FEATURES, IN_FEATURES) float32   (torch nn.Linear layout)
    bias:   (OUT_FEATURES,) float32
    use_kernel: None = auto (small batches use plain XLA), True/False = force.
    returns (..., OUT_FEATURES) float32
    """
    x = jnp.asarray(x, jnp.float32)
    orig_shape = x.shape
    if orig_shape[-1] != IN_FEATURES:
        raise ValueError(f"last dim of x must be {IN_FEATURES}, got {orig_shape[-1]}")
    x2d = x.reshape(-1, IN_FEATURES)
    batch = x2d.shape[0]

    w_flat = jnp.asarray(weight, jnp.float32).reshape(IN_FEATURES)   # (4,)
    b_flat = jnp.asarray(bias, jnp.float32).reshape(OUT_FEATURES)    # (1,)

    # ---- Small / empty batch fast path: one fused elementwise pass in XLA. ----
    if batch == 0 or use_kernel is False or (use_kernel is not True
                                             and batch < _FAST_PATH_MAX_BATCH):
        out = jnp.sum(x2d * w_flat[None, :], axis=-1, keepdims=True) + b_flat[0]
        return out.reshape(orig_shape[:-1] + (OUT_FEATURES,))

    # ---- Kernel path (large batches). ----
    # Only the ragged tail (< 32 rows) is padded; multiples of 32 pay nothing.
    # (jnp.pad rewrites the array, so this corner case costs one extra HBM pass.)
    pad_rows = (-batch) % _ROW_PACK
    if pad_rows:
        x2d = jnp.pad(x2d, ((0, pad_rows), (0, 0)))
    padded_batch = batch + pad_rows

    # FREE row-major reshape (no transpose, no copy): (padded_batch, 4) -> (R, 128).
    packed_rows = padded_batch // _ROW_PACK
    x_packed = x2d.reshape(packed_rows, _PACKED_WIDTH)

    # Block-diagonal weights Wb[4k+f, k] = w[f]  (128 x 32, 16 KiB, built once).
    w_block = (
        jnp.eye(_ROW_PACK, dtype=jnp.float32)[:, None, :] * w_flat[None, :, None]
    ).reshape(_PACKED_WIDTH, _ROW_PACK)

    # Tile: as large as fits default scoped VMEM (~8 MiB double-buffered at 4096
    # packed rows), shrinking for smaller inputs so the grid keeps >= _MIN_GRID_STEPS
    # steps (megacore sharding on v7x).  Partial final block is allowed (pl.cdiv).
    tbr = max(8, min(block_rows,
                     _round_up(pl.cdiv(packed_rows, _MIN_GRID_STEPS), 8)))
    grid = (pl.cdiv(packed_rows, tbr),)

    out_packed = pl.pallas_call(
        _linear_kernel,
        out_shape=jax.ShapeDtypeStruct((packed_rows, _ROW_PACK), jnp.float32),
        grid=grid,
        in_specs=[
            # Lane- and sublane-dense input tile straight from the natural layout.
            pl.BlockSpec((tbr, _PACKED_WIDTH), lambda i: (i, 0)),
            # Constant weight block: same block index every step -> DMA'd once.
            pl.BlockSpec((_PACKED_WIDTH, _ROW_PACK), lambda i: (0, 0)),
            # Bias as an SMEM scalar (no VMEM tile padding, no per-step DMA).
            pl.BlockSpec(memory_space=pltpu.MemorySpace.SMEM),
        ],
        out_specs=pl.BlockSpec((tbr, _ROW_PACK), lambda i: (i, 0)),
        compiler_params=pltpu.CompilerParams(
            dimension_semantics=("parallel",),
        ),
    )(x_packed, w_block, b_flat)

    out = out_packed.reshape(padded_batch)     # free reshape back to flat batch
    if pad_rows:
        out = out[:batch]                      # drop the <32 garbage tail rows
    return out.reshape(orig_shape[:-1] + (OUT_FEATURES,))


def init_params(key):
    """Deterministic init matching nn.Linear's default (uniform +/- 1/sqrt(fan_in))."""
    k_w, k_b = jax.random.split(key)
    bound = 1.0 / math.sqrt(IN_FEATURES)
    weight = jax.random.uniform(
        k_w, (OUT_FEATURES, IN_FEATURES), jnp.float32, -bound, bound
    )
    bias = jax.random.uniform(k_b, (OUT_FEATURES,), jnp.float32, -bound, bound)
    return weight, bias


# TODO(synk): ControlsPredictor.train (Adam + MSE optimization loop) and predict()'s
# host-side history packing are not forward-pass compute and are not translated.


if __name__ == "__main__":
    key = jax.random.PRNGKey(0)
    k_params, k_x1, k_x2, k_x3, k_x4 = jax.random.split(key, 5)

    weight, bias = init_params(k_params)

    def reference(xs):
        # Exact f32 reference (elementwise mul + 4-term sum; no matmul demotion).
        return jnp.sum(xs * weight.reshape(1, IN_FEATURES), axis=-1,
                       keepdims=True) + bias[0]

    # 1) Module-sized input (train()-style, 8 rows) -> small-batch XLA fast path.
    x_small = jax.random.normal(k_x1, (8, IN_FEATURES), jnp.float32)
    y_small = controls_predictor_forward(x_small, weight, bias)
    jax.block_until_ready(y_small)
    assert y_small.shape == (8, OUT_FEATURES)
    assert jnp.allclose(y_small, reference(x_small), atol=1e-5, rtol=1e-5)

    # 2) Pallas kernel path: batch multiple of 32 (zero-copy packing, partial
    #    final grid block).
    x_k = jax.random.normal(k_x2, (6400, IN_FEATURES), jnp.float32)
    y_k = controls_predictor_forward(x_k, weight, bias, use_kernel=True)
    jax.block_until_ready(y_k)
    assert y_k.shape == (6400, OUT_FEATURES)
    assert jnp.allclose(y_k, reference(x_k), atol=1e-5, rtol=1e-5)

    # 3) Pallas kernel path: ragged batch (exercises the <32-row tail pad + slice).
    x_r = jax.random.normal(k_x3, (1000, IN_FEATURES), jnp.float32)
    y_r = controls_predictor_forward(x_r, weight, bias, use_kernel=True)
    jax.block_until_ready(y_r)
    assert y_r.shape == (1000, OUT_FEATURES)
    assert jnp.allclose(y_r, reference(x_r), atol=1e-5, rtol=1e-5)

    # 4) Leading batch dims (stack of predict() inputs) -> fast path.
    x3 = jax.random.normal(k_x4, (2, 3, IN_FEATURES), jnp.float32)
    y3 = controls_predictor_forward(x3, weight, bias)
    jax.block_until_ready(y3)
    assert y3.shape == (2, 3, OUT_FEATURES)
    assert jnp.allclose(y3, reference(x3), atol=1e-5, rtol=1e-5)

    print("KERNEL_OK")
</pallas_src>

<mosaic_0001>
module attributes {stable_mosaic.version = 11 : i64} {
  func.func @_linear_kernel(%arg0: i32, %arg1: memref<56x128xf32, #tpu.memory_space<vmem>>, %arg2: memref<128x32xf32, #tpu.memory_space<vmem>>, %arg3: memref<1xf32, #tpu.memory_space<smem>>, %arg4: memref<56x32xf32, #tpu.memory_space<vmem>>) attributes {dimension_semantics = [#tpu.dimension_semantics<parallel>], iteration_bounds = array<i64: 4>, scalar_prefetch = 0 : i64, scratch_operands = 0 : i64, tpu.core_type = #tpu.core_type<tc>, window_params = [{transform_indices = @transform_0, window_bounds = array<i64: 56, 128>}, {pipeline_mode = #tpu.pipeline_mode<synchronous>, transform_indices = @transform_1, window_bounds = array<i64: 128, 32>}, {transform_indices = @transform_2, window_bounds = array<i64: 1>}, {transform_indices = @transform_3, window_bounds = array<i64: 56, 32>}]} {
    %c0 = arith.constant 0 : index
    %c0_0 = arith.constant 0 : index
    %0 = vector.load %arg1[%c0, %c0_0] : memref<56x128xf32, #tpu.memory_space<vmem>>, vector<56x128xf32>
    %c0_1 = arith.constant 0 : index
    %c0_2 = arith.constant 0 : index
    %1 = vector.load %arg2[%c0_1, %c0_2] : memref<128x32xf32, #tpu.memory_space<vmem>>, vector<128x32xf32>
    %cst = arith.constant dense<0.000000e+00> : vector<56x32xf32>
    %2 = tpu.matmul %0, %1, %cst {dimension_numbers = #tpu.dot_dimension_numbers<[1], [0], [0], [1], [0, 0, 1, 1], [], []>, precision = #tpu.contract_precision<fp32>} : vector<56x128xf32>, vector<128x32xf32>, vector<56x32xf32> -> vector<56x32xf32>
    %c0_3 = arith.constant 0 : index
    %3 = memref.load %arg3[%c0_3] : memref<1xf32, #tpu.memory_space<smem>>
    %4 = vector.broadcast %3 : f32 to vector<56x32xf32>
    %5 = arith.addf %2, %4 : vector<56x32xf32>
    %c0_4 = arith.constant 0 : index
    %c0_5 = arith.constant 0 : index
    %6 = vector.load %arg4[%c0_4, %c0_5] : memref<56x32xf32, #tpu.memory_space<vmem>>, vector<56x32xf32>
    tpu.vector_store %arg4[%c0_4, %c0_5], %5 {strides = array<i32>} : memref<56x32xf32, #tpu.memory_space<vmem>>, vector<56x32xf32>,
    return
  }
  func.func @transform_0(%arg0: i32) -> (i32, i32) {
    %c0_i32 = arith.constant 0 : i32
    %c0_i32_0 = arith.constant 0 : i32
    return %arg0, %c0_i32 : i32, i32
  }
  func.func @transform_1(%arg0: i32) -> (i32, i32) {
    %c0_i32 = arith.constant 0 : i32
    %c0_i32_0 = arith.constant 0 : i32
    %c0_i32_1 = arith.constant 0 : i32
    return %c0_i32, %c0_i32_0 : i32, i32
  }
  func.func @transform_2(%arg0: i32) -> i32 {
    %c0_i32 = arith.constant 0 : i32
    %c0_i32_0 = arith.constant 0 : i32
    return %c0_i32 : i32
  }
  func.func @transform_3(%arg0: i32) -> (i32, i32) {
    %c0_i32 = arith.constant 0 : i32
    %c0_i32_0 = arith.constant 0 : i32
    return %arg0, %c0_i32 : i32, i32
  }
}

</mosaic_0001>

<bundles_post_ra>
// kernel: tpu_custom_call.1
= control target key start
LH: loop header
LB: loop body
LE: loop exit
PB: predicated region body
PF: predicated region fallthrough
CT: control target
= control target key end

     0   :  { %s3008_s0 = inlined_call_operand.hbm [shape: f32[200,128], index: 0, kind: input, shape index: {}]   ;;  %s3009_s1 = inlined_call_operand.vmem [shape: f32[128,32], index: 1, kind: input, shape index: {}]   ;;  %s3010_s2 = inlined_call_operand.<no memory space> [shape: f32[1], index: 2, kind: input, shape index: {}]   ;;  %s3011_s3 = inlined_call_operand.vmem [shape: f32[200,32], index: 3, kind: output, shape index: {}]  }
   0x1   :  { %8 = sst [smem:[#allocation2]] %s3010_s2 }
   0x2   :  { %9 = vsyncpa [#allocation4], 0 }
   0x3   :  { %11 = vsyncpa [#allocation4 + $0x1], 0  ;;  %s2345_s14 = smov 0   ;;  %s2347_s15 = smov 0  }
   0x4   :  { %s2349_s16 = smov 0   ;;  %s2351_s17 = smov 0  }
   0x5 LB: > { %s2364_s2 = sadd.s32 4294967295, %s2282_s17   ;;  %s2367_s18 = sadd.s32 1, %s2282_s17   ;;  %s2282_s17 = sphi %s2351_s17, %s3041_s17   ;;  %s2278_s16 = sphi %s2349_s16, %s3040_s16   ;;  %s2274_s15 = sphi %s2347_s15, %s3039_s15   ;;  %s2270_s14 = sphi %s2345_s14, %s3038_s14  }
   0x6   : > { %s21_s19 = ssub.s32 %s2282_s17, %s2367_s18  ;;  %s24_s20 = sadd.s32 1, %s2278_s16 }
   0x7   : > { %p22_p0 = scmp.eq.s32.totalorder %s21_s19, 0  ;;  %p31_p1 = scmp.ne.s32.totalorder %s2278_s16, %s2274_s15 }
   0x8   : > { %p32_p2 = scmp.eq.s32.totalorder %s2282_s17, 0  ;;  %p37_p3 = scmp.ne.s32.totalorder %s2274_s15, %s2270_s14 }
   0x9   : > { %s2377_s21 = scalar_select %p22_p0, %s2278_s16, %s24_s20  }
   0xa   : > { %p33_p4 = por %p32_p2, %p31_p1  ;;  %p38_p5 = scmp.eq.s32.totalorder %s2364_s2, 0 }
   0xb   : > { %p103_p6 = scmp.eq.s32.totalorder %s2364_s2, 3  ;;  %p1388_p9 = scmp.ge.s32.totalorder %s2282_s17, 4 }
   0xc   : > { %p2381_p7 = por %p38_p5, %p37_p3 }
   0xd   : > { %p2385_p8 = por %p103_p6, %p31_p1  ;;  %131 = sbr.rel (%p1388_p9) target bundleno = 55 (0x37), region = 24 }
  0x14   : > { %134 = sbr.rel (!%p33_p4) target bundleno = 55 (0x37), region = 28  ;;  %s135_s24 = sand.u32 (%p33_p4), 1, %s2278_s16  }
  0x15   : > { %s140_s25 = smul.u32 (%p33_p4), 7, %s2282_s17  ;;  %s2395_s30 = scalar_lea.sflag (%p33_p4), [#allocation4], %s135_s24 }
  0x16   : > { %s2079_s26 = smul.u32 (%p33_p4), 56, %s135_s24 }
  0x17   : > { %s141_s27 = ssub.s32 (%p33_p4), 25, %s140_s25 }
  0x18   : > { %p142_p10 = scmp.lt.s32.totalorder (%p33_p4), %s141_s27, 7  ;;  %s139_s4 = scalar_lea.vmem (%p33_p4), [#allocation3], %s2079_s26 }
  0x1b   : > { %s3043_s27 = smov (!%p142_p10, %s141_s27), 7 }
  0x1c   : > { %s2392_s28 = sshll.u32 %s3043_s27, 7 }
  0x1d   : > { %s146_s29 = ssub.s32 896, %s2392_s28 }
  0x1e   : > { %147 = vsyncadd %s2395_s30, %s146_s29  ;;  %p1390_p11 = scmp.ne.s32.totalorder %s2392_s28, 0  ;;  %s1407_s5 = smul.u32 896, %s2282_s17 }
  0x1f   : > { %s152_s6 = sshll.u32 %s139_s4, 4  ;;  %s2192_s13 = scalar_lea.hbm %s3008_s0, 3200  ;;  %s2405_s6 = int_to_ptr.vmem [resolvable:$true] %s152_s6 }
  0x20   : > { %s2403_s9 = scalar_lea.hbm %s3008_s0, %s1407_s5 }
  0x21   : > { %s2188_s10 = scalar_lea.hbm %s2403_s9, %s2392_s28  ;;  %p2193_p1 = scmp.lt.u32.totalorder %s2403_s9, %s3008_s0 }
  0x22   : > { %p2189_p12 = scmp.ne.s32.totalorder %s2403_s9, %s2188_s10  ;;  %p2194_p2 = scmp.lt.u32.totalorder %s2192_s13, %s2188_s10 }
  0x23   : > { %p2196_p4 = scmp.lt.u32.totalorder %s2188_s10, %s2403_s9 }
  0x24   : > { %p2190_p13 = pnand %p2189_p12, %p1390_p11  ;;  %p2195_p3 = por %p2194_p2, %p2193_p1 }
  0x26   : > { %p2191_p0 = pneg %p2190_p13  ;;  %p2197_p5 = por %p2196_p4, %p2195_p3 }
  0x28   : > { %p2198_p6 = pnand %p2197_p5, %p2191_p0 }
  0x2a   : > { %2201 = shalt.err (!%p2198_p6)
}
  0x2b   : > { %s2202_s20 = scalar_lea.vmem %s2405_s6, %s2392_s28  ;;  %s2316_s24 = smov [#allocation3]  }
  0x2c   : > { %p2203_p9 = scmp.ne.s32.totalorder %s2405_s6, %s2202_s20  ;;  %s2206_s25 = sshll.u32 %s2316_s24, 4  ;;  %s2207_s25 = int_to_ptr.vmem [resolvable:$false] %s2206_s25 }
  0x2d   : > { %s2208_s26 = scalar_lea.vmem %s2207_s25, 1792  ;;  %p2209_p13 = scmp.lt.s32.totalorder %s2405_s6, %s2207_s25 }
  0x2e   : > { %p2204_p10 = pnand %p2203_p9, %p1390_p11  ;;  %p2210_p1 = scmp.lt.s32.totalorder %s2208_s26, %s2202_s20 }
  0x30   : > { %p2205_p12 = pneg %p2204_p10  ;;  %p2211_p2 = por %p2210_p1, %p2209_p13 }
  0x32   : > { %p2212_p3 = pnand %p2211_p2, %p2205_p12 }
  0x34   : > { %2215 = shalt.err (!%p2212_p3)
}
  0x35   : > { %s2317_s27 = smov 128   ;;  %s2318_s29 = smov 8  }
  0x36   : > { %158 = dma.hbm_to_vmem [thread:$0]  (%p1390_p11), %s2403_s9, %s2392_s28, %s2405_s6, %s2395_s30, %s2317_s27, %s2317_s27, %s2318_s29  }
  0x37 PF: > { %p1394_p0 = scmp.ge.s32.totalorder %s2282_s17, 1  ;;  %p160_p4 = scmp.lt.s32.totalorder %s2282_s17, 5 }
  0x39   : > { %p161_p5 = pnand %p1394_p0, %p160_p4 }
  0x3b   : > { %164 = sbr.rel (%p161_p5) target bundleno = 473 (0x1d9), region = 32 }
  0x42   : > { %s166_s4 = sand.u32 1, %s2274_s15  }
  0x43   : > { %s2435_s5 = smul.u32 56, %s166_s4  ;;  %s167_s7 = scalar_lea.sflag [#allocation4], %s166_s4 }
  0x45   : > { %s2438_s8 = scalar_lea.vmem [#allocation3], %s2435_s5 }
  0x46   : > { %2265 = dma.done.wait (%p2381_p7), %s167_s7, 896  }
  0x47   : > { %2267 = vsyncadd (%p2381_p7), %s167_s7, 4294966400  ;;  %v3020_v0 = vmov 0.0|0.0   ;;  %vm2320_vm0 = vmmov 0   ;;  %v3014_v1 = vmov 0.0   ;;  %v209_v2 = vld [vmem:[%s3009_s1] sm:$0xff]  ;;  %v210_v3 = vld [vmem:[%s3009_s1 + $0x8] sm:$0xff] }
  0x48   : > { %1865 = vmatprep.subr.bf16.mxu1 %v3020_v0  ;;  %1937 = vmatprep.subr.bf16.mxu0 %v3020_v0  ;;  %v211_v4 = vld [vmem:[%s3009_s1 + $0x10] sm:$0xff]  ;;  %v228_v5 = vand.u32 4294901760, %v209_v2  ;;  %v231_v6 = vand.u32 4294901760, %v210_v3  ;;  %v212_v7 = vld [vmem:[%s3009_s1 + $0x18] sm:$0xff]  ;;  %v213_v10 = vld [vmem:[%s3009_s1 + $0x20] sm:$0xff]  ;;  %vm1126_vm1 = vcmask 261120  }
  0x49   : > { %1579 = vmatprep.mubr.msk.f32.mxu1 %vm2320_vm0, %v3014_v1  ;;  %1738 = vmatprep.mubr.msk.f32.mxu0 %vm2320_vm0, %v3014_v1  ;;  %v234_v8 = vand.u32 4294901760, %v211_v4  ;;  %v237_v9 = vand.u32 4294901760, %v212_v7  ;;  %v2468_v11 = vld [vmem:[%s3009_s1 + $0x28] sm:$0xff]  ;;  %v240_v14 = vand.u32 4294901760, %v213_v10  ;;  %v2482_v16 = vld [vmem:[%s3009_s1 + $0x30] sm:$0xff]  ;;  %v2487_v17 = vld [vmem:[%s3009_s1 + $0x38] sm:$0xff] }
  0x4a   : > { %v2470_v12 = vpack.c.bf16 %v231_v6, %v228_v5  ;;  %v243_v15 = vand.u32 4294901760, %v2468_v11  ;;  %v246_v19 = vand.u32 4294901760, %v2482_v16  ;;  %v249_v20 = vand.u32 4294901760, %v2487_v17  ;;  %v2500_v21 = vld [vmem:[%s3009_s1 + $0x40] sm:$0xff]  ;;  %v2505_v22 = vld [vmem:[%s3009_s1 + $0x48] sm:$0xff]  ;;  %v2523_v27 = vld [vmem:[%s3009_s1 + $0x50] sm:$0xff] }
  0x4b   : > { %v2474_v13 = vpack.c.bf16 %v237_v9, %v234_v8  ;;  %v252_v24 = vand.u32 4294901760, %v2500_v21  ;;  %v255_v25 = vand.u32 4294901760, %v2505_v22  ;;  %v202_v26 = vld [vmem:[%s2438_s8] sm:$0xff]  ;;  %v2530_v29 = vsub.f32 %v209_v2, %v228_v5  ;;  %v203_v35 = vld [vmem:[%s2438_s8 + $0x8] sm:$0xff]  ;;  %v204_v43 = vld [vmem:[%s2438_s8 + $0x10] sm:$0xff]  ;;  %s2933_s20 = scalar_lea.vmem [#allocation5], %s2435_s5  }
  0x4c   : > { %1867 = vmatpush3.bf16.msra.mxu1 %v2470_v12  ;;  %1939 = vmatpush3.bf16.msra.mxu0 %v2470_v12  ;;  %v2491_v18 = vpack.c.bf16 %v243_v15, %v240_v14  ;;  %v2513_v23 = vpack.c.bf16 %v249_v20, %v246_v19  ;;  %v2528_v28 = vld [vmem:[%s3009_s1 + $0x58] sm:$0xff]  ;;  %v2532_v30 = vsub.f32 %v210_v3, %v231_v6  ;;  %v2534_v31 = vand.u32 4294901760, %v202_v26  ;;  %v2554_v37 = vld [vmem:[%s3009_s1 + $0x60] sm:$0xff]  ;;  %v2559_v38 = vld [vmem:[%s3009_s1 + $0x68] sm:$0xff]  ;;  %s1141_s5 = smul.u32 (%p2385_p8), 7, %s2364_s2 }
  0x4d   : > { %1868 = vmatprep.subr.bf16.mxu1 %v3020_v0  ;;  %1940 = vmatprep.subr.bf16.mxu0 %v3020_v0  ;;  %v2542_v32 = vpack.c.bf16 %v255_v25, %v252_v24  ;;  %v258_v33 = vand.u32 4294901760, %v2523_v27  ;;  %v261_v34 = vand.u32 4294901760, %v2528_v28  ;;  %v2547_v36 = vsub.f32 %v211_v4, %v234_v8  ;;  %v2586_v48 = vld [vmem:[%s3009_s1 + $0x70] sm:$0xff]  ;;  %v2591_v49 = vld [vmem:[%s3009_s1 + $0x78] sm:$0xff]  ;;  %s1408_s24 = smul.u32 (%p2385_p8), 56, %s2364_s2 }
  0x4e   : > { %v381_v39 = vand.u32 4294901760, %v2530_v29  ;;  %v388_v40 = vand.u32 4294901760, %v2532_v30  ;;  %v2564_v41 = vsub.f32 %v202_v26, %v2534_v31  ;;  %v2566_v42 = vand.u32 4294901760, %v203_v35  ;;  %v205_v62 = vld [vmem:[%s2438_s8 + $0x18] sm:$0xff]  ;;  %s1142_s25 = ssub.s32 (%p2385_p8), 25, %s1141_s5 }
  0x4f   : > { %v2569_v44 = vsub.f32 %v212_v7, %v237_v9  ;;  %v2577_v45 = vpack.c.bf16 %v261_v34, %v258_v33  ;;  %v264_v46 = vand.u32 4294901760, %v2554_v37  ;;  %v267_v47 = vand.u32 4294901760, %v2559_v38  ;;  %p1143_p7 = scmp.lt.s32.totalorder (%p2385_p8), %s1142_s25, 7  ;;  %s2956_s29 = scalar_lea.vmem (%p2385_p8), %s3011_s3, %s1408_s24  }
  0x50   : > { %1870 = vmatpush3.bf16.msra.mxu1 %v2474_v13  ;;  %1942 = vmatpush3.bf16.msra.mxu0 %v2474_v13  ;;  %v395_v50 = vand.u32 4294901760, %v2547_v36  ;;  %v2594_v51 = vsub.f32 %v213_v10, %v240_v14  ;;  %v382_v52 = vsub.f32 %v2530_v29, %v381_v39  ;;  %v389_v53 = vsub.f32 %v2532_v30, %v388_v40 }
  0x51   : > { %1871 = vmatprep.subr.bf16.mxu1 %v3020_v0  ;;  %1943 = vmatprep.subr.bf16.mxu0 %v3020_v0  ;;  %v2598_v54 = vand.u32 4294901760, %v204_v43  ;;  %v2601_v55 = vsub.f32 %v2468_v11, %v243_v15  ;;  %v310_v56 = vand.u32 4294901760, %v2564_v41  ;;  %v2605_v57 = vsub.f32 %v203_v35, %v2566_v42 }
  0x52   : > { %v2613_v58 = vpack.c.bf16 %v267_v47, %v264_v46  ;;  %v3013_v59 = vand.u32 4294901760, %v2586_v48  ;;  %v3012_v60 = vand.u32 4294901760, %v2591_v49  ;;  %v402_v61 = vand.u32 4294901760, %v2569_v44 }
  0x53   : > { %v396_v63 = vsub.f32 %v2547_v36, %v395_v50  ;;  %v383_v2 = vand.u32 4294901760, %v382_v52  ;;  %v390_v3 = vand.u32 4294901760, %v389_v53  ;;  %v409_v4 = vand.u32 4294901760, %v2594_v51 }
  0x54   : > { %1873 = vmatpush3.bf16.msra.mxu1 %v2491_v18  ;;  %1945 = vmatpush3.bf16.msra.mxu0 %v2491_v18  ;;  %v2624_v5 = vsub.f32 %v204_v43, %v2598_v54  ;;  %v2629_v6 = vsub.f32 %v2482_v16, %v246_v19  ;;  %v311_v7 = vsub.f32 %v2564_v41, %v310_v56  ;;  %v320_v8 = vand.u32 4294901760, %v2605_v57  ;;  %v206_v16 = vld [vmem:[%s2438_s8 + $0x20] sm:$0xff] }
  0x55   : > { %1874 = vmatprep.subr.bf16.mxu1 %v3020_v0  ;;  %1946 = vmatprep.subr.bf16.mxu0 %v3020_v0  ;;  %v2633_v9 = vand.u32 4294901760, %v205_v62  ;;  %v2638_v10 = vsub.f32 %v2487_v17, %v249_v20  ;;  %v2646_v11 = vpack.c.bf16 %v3012_v60, %v3013_v59  ;;  %v403_v14 = vsub.f32 %v2569_v44, %v402_v61 }
  0x56   : > { %v416_v15 = vand.u32 4294901760, %v2601_v55  ;;  %v2654_v17 = vsub.f32 %v2500_v21, %v252_v24  ;;  %v2659_v19 = vsub.f32 %v2505_v22, %v255_v25  ;;  %v1962_v20 = vpack.c.bf16 %v388_v40, %v381_v39 }
  0x57   : > { %v1890_v26 = vpack.c.bf16 %v390_v3, %v383_v2  ;;  %v397_v35 = vand.u32 4294901760, %v396_v63  ;;  %v410_v43 = vsub.f32 %v2594_v51, %v409_v4  ;;  %v330_v52 = vand.u32 4294901760, %v2624_v5  ;;  %v207_v2 = vld [vmem:[%s2438_s8 + $0x28] sm:$0xff] }
  0x58   : > { %1876 = vmatpush3.bf16.msra.mxu1 %v2513_v23  ;;  %1948 = vmatpush3.bf16.msra.mxu0 %v2513_v23  ;;  %v312_v53 = vand.u32 4294901760, %v311_v7  ;;  %v321_v21 = vsub.f32 %v2605_v57, %v320_v8  ;;  %v2667_v24 = vsub.f32 %v205_v62, %v2633_v9  ;;  %v2669_v22 = vand.u32 4294901760, %v206_v16 }
  0x59   : > { %1877 = vmatprep.subr.bf16.mxu1 %v3020_v0  ;;  %1949 = vmatprep.subr.bf16.mxu0 %v3020_v0  ;;  %v404_v25 = vand.u32 4294901760, %v403_v14  ;;  %v417_v39 = vsub.f32 %v2601_v55, %v416_v15  ;;  %v3019_v40 = vand.u32 4294901760, %v2629_v6  ;;  %v3018_v63 = vand.u32 4294901760, %v2638_v10 }
  0x5a   : > { %v2680_v3 = vsub.f32 %v2523_v27, %v258_v33  ;;  %v2685_v62 = vsub.f32 %v2528_v28, %v261_v34  ;;  %v1965_v7 = vpack.c.bf16 %v402_v61, %v395_v50  ;;  %v411_v14 = vand.u32 4294901760, %v410_v43 }
  0x5b   : > { %v331_v60 = vsub.f32 %v2624_v5, %v330_v52  ;;  %v3016_v59 = vand.u32 4294901760, %v2654_v17  ;;  %v3017_v27 = vand.u32 4294901760, %v2659_v19  ;;  %v322_v33 = vand.u32 4294901760, %v321_v21 }
  0x5c   : > { %1879 = vmatpush3.bf16.msra.mxu1 %v2542_v32  ;;  %1951 = vmatpush3.bf16.msra.mxu0 %v2542_v32  ;;  %v340_v28 = vand.u32 4294901760, %v2667_v24  ;;  %v2696_v34 = vsub.f32 %v206_v16, %v2669_v22  ;;  %v2698_v1 = vand.u32 4294901760, %v207_v2  ;;  %v1893_v50 = vpack.c.bf16 %v404_v25, %v397_v35 }
  0x5d   : > { %1880 = vmatprep.subr.bf16.mxu1 %v3020_v0  ;;  %1952 = vmatprep.subr.bf16.mxu0 %v3020_v0  ;;  %v418_v61 = vand.u32 4294901760, %v417_v39  ;;  %v424_v43 = vsub.f32 %v2629_v6, %v3019_v40  ;;  %v2710_v16 = vsub.f32 %v2554_v37, %v264_v46  ;;  %v3026_v35 = vmov 0.0  }
  0x5e   : > { %3025 = vst [vmem:[#allocation7_spill] sm:$0xff] %v2696_v34  ;;  %v332_v21 = vand.u32 4294901760, %v331_v60  ;;  %v438_v37 = vsub.f32 %v2654_v17, %v3016_v59  ;;  %v451_v46 = vand.u32 4294901760, %v2680_v3 }
  0x5f   : > { %v1896_v25 = vpack.c.bf16 %v418_v61, %v411_v14  ;;  %v425_v39 = vand.u32 4294901760, %v424_v43 }
  0x60   : > { %1882 = vmatpush3.bf16.msra.mxu1 %v2577_v45  ;;  %1954 = vmatpush3.bf16.msra.mxu0 %v2577_v45 }
  0x61   : > { %1883 = vmatprep.subr.bf16.mxu1 %v3020_v0  ;;  %1955 = vmatprep.subr.bf16.mxu0 %v3020_v0 }
  0x64   : > { %1885 = vmatpush3.bf16.msra.mxu1 %v2613_v58  ;;  %1957 = vmatpush3.bf16.msra.mxu0 %v2613_v58 }
  0x65   : > { %1886 = vmatprep.subr.bf16.mxu1 %v3020_v0  ;;  %1958 = vmatprep.subr.bf16.mxu0 %v3020_v0 }
  0x68   : > { %1888 = vmatpush3.bf16.msra.mxu1 %v2646_v11  ;;  %1960 = vmatpush3.bf16.msra.mxu0 %v2646_v11 }
  0x69   : > { %1889 = vmatprep.subr.bf16.mxu1 %v3020_v0  ;;  %1961 = vmatprep.subr.bf16.mxu0 %v3020_v0 }
  0x6b   : > { %1580 = vmatmul.mubr.f32.vlgmr.msra.gmra.mrb[0].mxu1 %v312_v53  ;;  %1739 = vmatmul.mubr.f32.vlgmr.msra.gmra.mrb[0].mxu0 %v310_v56  ;;  %v431_v56 = vsub.f32 %v2638_v10, %v3018_v63  ;;  %v208_v53 = vld [vmem:[%s2438_s8 + $0x30] sm:$0xff]  ;;  %v3027_v63 = vand.u32 4294901760, %v2586_v48  ;;  %s225_s8 = sld [smem:[#allocation2]] }
  0x6c   : > { %1891 = vmatpush3.bf16.msra.mxu1 %v1890_v26  ;;  %1963 = vmatpush3.bf16.msra.mxu0 %v1962_v20  ;;  %v2715_v20 = vsub.f32 %v2559_v38, %v267_v47  ;;  %v1968_v26 = vpack.c.bf16 %v416_v15, %v409_v4  ;;  %v445_v38 = vsub.f32 %v2659_v19, %v3017_v27  ;;  %v350_v4 = vand.u32 4294901760, %v2696_v34 }
  0x6d   : > { %1892 = vmatprep.subr.bf16.mxu1 %v3020_v0  ;;  %1964 = vmatprep.subr.bf16.mxu0 %v3020_v0  ;;  %v341_v47 = vsub.f32 %v2667_v24, %v340_v28  ;;  %v2733_v15 = vsub.f32 %v207_v2, %v2698_v1  ;;  %v2735_v60 = vand.u32 4294901760, %v208_v53  ;;  %v432_v59 = vand.u32 4294901760, %v431_v56 }
  0x6e   : > { %1582 = vmatprep.mubr.msk.f32.mxu1 %vm2320_vm0, %v3026_v35  ;;  %1741 = vmatprep.mubr.msk.f32.mxu0 %vm2320_vm0, %v3026_v35  ;;  %v458_v27 = vand.u32 4294901760, %v2685_v62  ;;  %v439_v2 = vand.u32 4294901760, %v438_v37  ;;  %v351_v14 = vsub.f32 %v2696_v34, %v350_v4  ;;  %v3029_v56 = vand.u32 4294901760, %v2629_v6 }
  0x6f   : > { %1583 = vmatmul.mubr.f32.gmra.mrb[2].mxu1 %v322_v33  ;;  %1742 = vmatmul.mubr.f32.gmra.mrb[2].mxu0 %v320_v8  ;;  %v2741_v8 = vsub.f32 %v2586_v48, %v3027_v63  ;;  %v3028_v33 = vand.u32 4294901760, %v2591_v49  ;;  %v452_v48 = vsub.f32 %v2680_v3, %v451_v46  ;;  %v465_v63 = vand.u32 4294901760, %v2710_v16 }
  0x70   : > { %1894 = vmatpush3.bf16.msra.mxu1 %v1893_v50  ;;  %1966 = vmatpush3.bf16.msra.mxu0 %v1965_v7  ;;  %v446_v7 = vand.u32 4294901760, %v445_v38  ;;  %v360_v50 = vand.u32 4294901760, %v2733_v15  ;;  %v2761_v61 = vsub.f32 %v208_v53, %v2735_v60  ;;  %v1899_v43 = vpack.c.bf16 %v432_v59, %v425_v39 }
  0x71   : > { %v2746_v40 = vsub.f32 %v2591_v49, %v3028_v33  ;;  %1895 = vmatprep.subr.bf16.mxu1 %v3020_v0  ;;  %1967 = vmatprep.subr.bf16.mxu0 %v3020_v0  ;;  %v342_v49 = vand.u32 4294901760, %v341_v47  ;;  %v3030_v37 = vand.u32 4294901760, %v2638_v10  ;;  %v3031_v53 = vand.u32 4294901760, %v2654_v17 }
  0x72   : > { %1585 = vmatprep.mubr.msk.f32.mxu1 %vm2320_vm0, %v3026_v35  ;;  %1744 = vmatprep.mubr.msk.f32.mxu0 %vm2320_vm0, %v3026_v35  ;;  %v1902_v59 = vpack.c.bf16 %v446_v7, %v439_v2  ;;  %v352_v39 = vand.u32 4294901760, %v351_v14  ;;  %v361_v33 = vsub.f32 %v2733_v15, %v360_v50  ;;  %v479_v7 = vand.u32 4294901760, %v2741_v8 }
  0x73   : > { %1586 = vmatmul.mubr.f32.gmra.mrb[4].mxu1 %v332_v21  ;;  %1745 = vmatmul.mubr.f32.gmra.mrb[4].mxu0 %v330_v52  ;;  %v1971_v38 = vpack.c.bf16 %v3030_v37, %v3029_v56  ;;  %v459_v21 = vsub.f32 %v2685_v62, %v458_v27  ;;  %v472_v52 = vand.u32 4294901760, %v2715_v20  ;;  %v466_v56 = vsub.f32 %v2710_v16, %v465_v63 }
  0x74   : > { %1897 = vmatpush3.bf16.msra.mxu1 %v1896_v25  ;;  %1969 = vmatpush3.bf16.msra.mxu0 %v1968_v26  ;;  %v3032_v26 = vand.u32 4294901760, %v2659_v19  ;;  %v453_v25 = vand.u32 4294901760, %v452_v48  ;;  %v370_v37 = vand.u32 4294901760, %v2761_v61  ;;  %v486_v34 = vand.u32 4294901760, %v2746_v40 }
  0x75   : > { %1898 = vmatprep.subr.bf16.mxu1 %v3020_v0  ;;  %1970 = vmatprep.subr.bf16.mxu0 %v3020_v0  ;;  %v460_v0 = vand.u32 4294901760, %v459_v21  ;;  %v473_v2 = vsub.f32 %v2715_v20, %v472_v52  ;;  %v362_v48 = vand.u32 4294901760, %v361_v33  ;;  %v480_v21 = vsub.f32 %v2741_v8, %v479_v7 }
  0x76   : > { %1588 = vmatprep.mubr.msk.f32.mxu1 %vm2320_vm0, %v3026_v35  ;;  %1747 = vmatprep.mubr.msk.f32.mxu0 %vm2320_vm0, %v3026_v35  ;;  %v1974_v47 = vpack.c.bf16 %v3032_v26, %v3031_v53  ;;  %v3033_v53 = vmov 0.0|0.0   ;;  %v371_v14 = vsub.f32 %v2761_v61, %v370_v37  ;;  %v487_v26 = vsub.f32 %v2746_v40, %v486_v34 }
  0x77   : > { %1589 = vmatmul.mubr.f32.gmra.mrb[6].mxu1 %v342_v49  ;;  %1748 = vmatmul.mubr.f32.gmra.mrb[6].mxu0 %v340_v28  ;;  %v1977_v28 = vpack.c.bf16 %v458_v27, %v451_v46  ;;  %v467_v49 = vand.u32 4294901760, %v466_v56  ;;  %v1980_v46 = vpack.c.bf16 %v472_v52, %v465_v63  ;;  %v1914_v63 = vpack.c.bf16 %v2532_v30, %v2530_v29 }
  0x78   : > { %1900 = vmatpush3.bf16.msra.mxu1 %v1899_v43  ;;  %1972 = vmatpush3.bf16.msra.mxu0 %v1971_v38  ;;  %v1905_v43 = vpack.c.bf16 %v460_v0, %v453_v25  ;;  %v474_v38 = vand.u32 4294901760, %v473_v2  ;;  %v372_v27 = vand.u32 4294901760, %v371_v14  ;;  %v1932_v29 = vpack.c.bf16 %v2715_v20, %v2710_v16 }
  0x79   : > { %1901 = vmatprep.subr.bf16.mxu1 %v3033_v53  ;;  %1973 = vmatprep.subr.bf16.mxu0 %v3033_v53  ;;  %v1935_v30 = vpack.c.bf16 %v2746_v40, %v2741_v8 }
  0x7a   : > { %1591 = vmatprep.mubr.msk.f32.mxu1 %vm2320_vm0, %v3026_v35  ;;  %1750 = vmatprep.mubr.msk.f32.mxu0 %vm2320_vm0, %v3026_v35  ;;  %v1908_v0 = vpack.c.bf16 %v474_v38, %v467_v49 }
  0x7b   : > { %1592 = vmatmul.mubr.f32.gmra.mrb[8].mxu1 %v352_v39  ;;  %1751 = vmatmul.mubr.f32.gmra.mrb[8].mxu0 %v350_v4  ;;  %v481_v4 = vand.u32 4294901760, %v480_v21 }
  0x7c   : > { %1903 = vmatpush3.bf16.msra.mxu1 %v1902_v59  ;;  %1975 = vmatpush3.bf16.msra.mxu0 %v1974_v47  ;;  %v488_v59 = vand.u32 4294901760, %v487_v26  ;;  %v1983_v47 = vpack.c.bf16 %v486_v34, %v479_v7  ;;  %v1917_v34 = vpack.c.bf16 %v2569_v44, %v2547_v36 }
  0x7d   : > { %1904 = vmatprep.subr.bf16.mxu1 %v3033_v53  ;;  %1976 = vmatprep.subr.bf16.mxu0 %v3033_v53 }
  0x7e   : > { %1594 = vmatprep.mubr.msk.f32.mxu1 %vm2320_vm0, %v3026_v35  ;;  %1753 = vmatprep.mubr.msk.f32.mxu0 %vm2320_vm0, %v3026_v35 }
  0x7f   : > { %1595 = vmatmul.mubr.f32.gmra.mrb[10].mxu1 %v362_v48  ;;  %1754 = vmatmul.mubr.f32.gmra.mrb[10].mxu0 %v360_v50  ;;  %v1911_v50 = vpack.c.bf16 %v488_v59, %v481_v4 }
  0x80   : > { %1906 = vmatpush3.bf16.msra.mxu1 %v1905_v43  ;;  %1978 = vmatpush3.bf16.msra.mxu0 %v1977_v28 }
  0x81   : > { %1907 = vmatprep.subr.bf16.mxu1 %v3033_v53  ;;  %1979 = vmatprep.subr.bf16.mxu0 %v3033_v53 }
  0x82   : > { %1597 = vmatprep.mubr.msk.f32.mxu1 %vm2320_vm0, %v3026_v35  ;;  %1756 = vmatprep.mubr.msk.f32.mxu0 %vm2320_vm0, %v3026_v35 }
  0x83   : > { %1598 = vmatmul.mubr.f32.gmra.mrb[12].mxu1 %v372_v27  ;;  %1757 = vmatmul.mubr.f32.gmra.mrb[12].mxu0 %v370_v37 }
  0x84   : > { %1909 = vmatpush3.bf16.msra.mxu1 %v1908_v0  ;;  %1981 = vmatpush3.bf16.msra.mxu0 %v1980_v46 }
  0x85   : > { %1910 = vmatprep.subr.bf16.mxu1 %v3033_v53  ;;  %1982 = vmatprep.subr.bf16.mxu0 %v3033_v53 }
  0x86   : > { %1632 = vmatprep.mubr.msk.f32.mxu1 %vm2320_vm0, %v3026_v35  ;;  %1791 = vmatprep.mubr.msk.f32.mxu0 %vm2320_vm0, %v3026_v35 }
  0x88   : > { %1912 = vmatpush3.bf16.msra.mxu1 %v1911_v50  ;;  %1984 = vmatpush3.bf16.msra.mxu0 %v1983_v47 }
  0x89   : > { %1913 = vmatprep.subr.bf16.mxu1 %v3033_v53  ;;  %1985 = vmatprep.subr.bf16.mxu0 %v3033_v53 }
  0x8b   : > { %1633 = vmatmul.mubr.f32.vlgmr.msra.gmra.mrb[0].mxu1 %v2534_v31  ;;  %1792 = vmatmul.mubr.f32.vlgmr.msra.gmra.mrb[0].mxu0 %v2534_v31 }
  0x8c   : > { %1915 = vmatpush3.bf16.msra.mxu1 %v1914_v63  ;;  %1987 = vmatpush3.bf16.msra.mxu0 %v2470_v12  ;;  %v1920_v12 = vpack.c.bf16 %v2601_v55, %v2594_v51 }
  0x8d   : > { %1916 = vmatprep.subr.bf16.mxu1 %v3033_v53  ;;  %1988 = vmatprep.subr.bf16.mxu0 %v3033_v53 }
  0x8e   : > { %1635 = vmatprep.mubr.msk.f32.mxu1 %vm2320_vm0, %v3026_v35  ;;  %1794 = vmatprep.mubr.msk.f32.mxu0 %vm2320_vm0, %v3026_v35 }
  0x8f   : > { %1636 = vmatmul.mubr.f32.gmra.mrb[2].mxu1 %v2566_v42  ;;  %1795 = vmatmul.mubr.f32.gmra.mrb[2].mxu0 %v2566_v42 }
  0x90   : > { %1918 = vmatpush3.bf16.msra.mxu1 %v1917_v34  ;;  %1990 = vmatpush3.bf16.msra.mxu0 %v2474_v13  ;;  %v1923_v13 = vpack.c.bf16 %v2638_v10, %v2629_v6 }
  0x91   : > { %1919 = vmatprep.subr.bf16.mxu1 %v3033_v53  ;;  %1991 = vmatprep.subr.bf16.mxu0 %v3033_v53 }
  0x92   : > { %1638 = vmatprep.mubr.msk.f32.mxu1 %vm2320_vm0, %v3026_v35  ;;  %1797 = vmatprep.mubr.msk.f32.mxu0 %vm2320_vm0, %v3026_v35 }
  0x93   : > { %1639 = vmatmul.mubr.f32.gmra.mrb[4].mxu1 %v2598_v54  ;;  %1798 = vmatmul.mubr.f32.gmra.mrb[4].mxu0 %v2598_v54 }
  0x94   : > { %1921 = vmatpush3.bf16.msra.mxu1 %v1920_v12  ;;  %1993 = vmatpush3.bf16.msra.mxu0 %v2491_v18  ;;  %v1926_v18 = vpack.c.bf16 %v2659_v19, %v2654_v17 }
  0x95   : > { %1922 = vmatprep.subr.bf16.mxu1 %v3033_v53  ;;  %1994 = vmatprep.subr.bf16.mxu0 %v3033_v53 }
  0x96   : > { %1641 = vmatprep.mubr.msk.f32.mxu1 %vm2320_vm0, %v3026_v35  ;;  %1800 = vmatprep.mubr.msk.f32.mxu0 %vm2320_vm0, %v3026_v35 }
  0x97   : > { %1642 = vmatmul.mubr.f32.gmra.mrb[6].mxu1 %v2633_v9  ;;  %1801 = vmatmul.mubr.f32.gmra.mrb[6].mxu0 %v2633_v9 }
  0x98   : > { %1924 = vmatpush3.bf16.msra.mxu1 %v1923_v13  ;;  %1996 = vmatpush3.bf16.msra.mxu0 %v2513_v23  ;;  %v1929_v23 = vpack.c.bf16 %v2685_v62, %v2680_v3 }
  0x99   : > { %1925 = vmatprep.subr.bf16.mxu1 %v3033_v53  ;;  %1997 = vmatprep.subr.bf16.mxu0 %v3033_v53 }
  0x9a   : > { %1644 = vmatprep.mubr.msk.f32.mxu1 %vm2320_vm0, %v3026_v35  ;;  %1803 = vmatprep.mubr.msk.f32.mxu0 %vm2320_vm0, %v3026_v35 }
  0x9b   : > { %1645 = vmatmul.mubr.f32.gmra.mrb[8].mxu1 %v2669_v22  ;;  %1804 = vmatmul.mubr.f32.gmra.mrb[8].mxu0 %v2669_v22 }
  0x9c   : > { %1927 = vmatpush3.bf16.msra.mxu1 %v1926_v18  ;;  %1999 = vmatpush3.bf16.msra.mxu0 %v2542_v32  ;;  %v226_v32 = vstv %s225_s8 }
  0x9d   : > { %1928 = vmatprep.subr.bf16.mxu1 %v3033_v53  ;;  %2000 = vmatprep.subr.bf16.mxu0 %v3033_v53 }
  0x9e   : > { %1647 = vmatprep.mubr.msk.f32.mxu1 %vm2320_vm0, %v3026_v35  ;;  %1806 = vmatprep.mubr.msk.f32.mxu0 %vm2320_vm0, %v3026_v35 }
  0x9f   : > { %1648 = vmatmul.mubr.f32.gmra.mrb[10].mxu1 %v2698_v1  ;;  %1807 = vmatmul.mubr.f32.gmra.mrb[10].mxu0 %v2698_v1 }
  0xa0   : > { %1930 = vmatpush3.bf16.msra.mxu1 %v1929_v23  ;;  %2002 = vmatpush3.bf16.msra.mxu0 %v2577_v45 }
  0xa1   : > { %1931 = vmatprep.subr.bf16.mxu1 %v3033_v53  ;;  %2003 = vmatprep.subr.bf16.mxu0 %v3033_v53 }
  0xa2   : > { %1650 = vmatprep.mubr.msk.f32.mxu1 %vm2320_vm0, %v3026_v35  ;;  %1809 = vmatprep.mubr.msk.f32.mxu0 %vm2320_vm0, %v3026_v35 }
  0xa3   : > { %1651 = vmatmul.mubr.f32.gmra.mrb[12].mxu1 %v2735_v60  ;;  %1810 = vmatmul.mubr.f32.gmra.mrb[12].mxu0 %v2735_v60 }
  0xa4   : > { %1933 = vmatpush3.bf16.msra.mxu1 %v1932_v29  ;;  %2005 = vmatpush3.bf16.msra.mxu0 %v2613_v58 }
  0xa5   : > { %1934 = vmatprep.subr.bf16.mxu1 %v3033_v53  ;;  %2006 = vmatprep.subr.bf16.mxu0 %v3033_v53 }
  0xa6   : > { %1685 = vmatprep.mubr.msk.f32.mxu1 %vm2320_vm0, %v3026_v35  ;;  %1844 = vmatprep.mubr.msk.f32.mxu0 %vm2320_vm0, %v3026_v35 }
  0xa8   : > { %1936 = vmatpush3.bf16.msra.mxu1 %v1935_v30  ;;  %2008 = vmatpush3.bf16.msra.mxu0 %v2646_v11 }
  0xab   : > { %1686 = vmatmul.mubr.f32.vlgmr.msra.gmra.mrb[0].mxu1 %v2564_v41  ;;  %1845 = vmatmul.mubr.f32.vlgmr.msra.gmra.mrb[0].mxu0 %v2534_v31  ;;  %v3034_v31 = vld [vmem:[#allocation7_spill] sm:$0xff] }
  0xac   : > { %1688 = vmatprep.mubr.msk.f32.mxu1 %vm2320_vm0, %v3026_v35  ;;  %1847 = vmatprep.mubr.msk.f32.mxu0 %vm2320_vm0, %v3026_v35 }
  0xaf   : > { %1689 = vmatmul.mubr.f32.gmra.mrb[2].mxu1 %v2605_v57  ;;  %1848 = vmatmul.mubr.f32.gmra.mrb[2].mxu0 %v2566_v42 }
  0xb0   : > { %1691 = vmatprep.mubr.msk.f32.mxu1 %vm2320_vm0, %v3026_v35  ;;  %1850 = vmatprep.mubr.msk.f32.mxu0 %vm2320_vm0, %v3026_v35 }
  0xb3   : > { %1692 = vmatmul.mubr.f32.gmra.mrb[4].mxu1 %v2624_v5  ;;  %1851 = vmatmul.mubr.f32.gmra.mrb[4].mxu0 %v2598_v54 }
  0xb4   : > { %1694 = vmatprep.mubr.msk.f32.mxu1 %vm2320_vm0, %v3026_v35  ;;  %1853 = vmatprep.mubr.msk.f32.mxu0 %vm2320_vm0, %v3026_v35 }
  0xb7   : > { %1695 = vmatmul.mubr.f32.gmra.mrb[6].mxu1 %v2667_v24  ;;  %1854 = vmatmul.mubr.f32.gmra.mrb[6].mxu0 %v2633_v9 }
  0xb8   : > { %1697 = vmatprep.mubr.msk.f32.mxu1 %vm2320_vm0, %v3026_v35  ;;  %1856 = vmatprep.mubr.msk.f32.mxu0 %vm2320_vm0, %v3026_v35 }
  0xbb   : > { %1698 = vmatmul.mubr.f32.gmra.mrb[8].mxu1 %v3034_v31  ;;  %1857 = vmatmul.mubr.f32.gmra.mrb[8].mxu0 %v2669_v22 }
  0xbc   : > { %1700 = vmatprep.mubr.msk.f32.mxu1 %vm2320_vm0, %v3026_v35  ;;  %1859 = vmatprep.mubr.msk.f32.mxu0 %vm2320_vm0, %v3026_v35 }
  0xbf   : > { %1701 = vmatmul.mubr.f32.gmra.mrb[10].mxu1 %v2733_v15  ;;  %1860 = vmatmul.mubr.f32.gmra.mrb[10].mxu0 %v2698_v1 }
  0xc0   : > { %1703 = vmatprep.mubr.msk.f32.mxu1 %vm2320_vm0, %v3026_v35  ;;  %1862 = vmatprep.mubr.msk.f32.mxu0 %vm2320_vm0, %v3026_v35 }
  0xc3   : > { %1704 = vmatmul.mubr.f32.gmra.mrb[12].mxu1 %v2761_v61  ;;  %1863 = vmatmul.mubr.f32.gmra.mrb[12].mxu0 %v2735_v60 }
 0x17e   : > { %v665_v36 = vpop.f32.mrb[0].mxu1  ;;  %v1086_v41 = vpop.f32.mrb[0].mxu0 }
 0x17f   : > { %v2009_v42 = vadd.f32 %v665_v36, %v226_v32  ;;  %v1687_v44 = vpop.f32.mrb[1].mxu1  ;;  %v1846_v45 = vpop.f32.mrb[1].mxu0 }
 0x181   : > { %v2010_v1 = vadd.f32 %v2009_v42, %v1086_v41 }
 0x182   : > { %v672_v51 = vpop.f32.mrb[2].mxu1  ;;  %v1092_v54 = vpop.f32.mrb[2].mxu0 }
 0x183   : > { %1127 = vst.msk [vmem:[%s2933_s20] sm:$0xff] %vm1126_vm1, %v2010_v1  ;;  %v2011_v55 = vadd.f32 %v672_v51, %v226_v32  ;;  %v1690_v57 = vpop.f32.mrb[3].mxu1  ;;  %v1849_v58 = vpop.f32.mrb[3].mxu0 }
 0x185   : > { %v2012_v5 = vadd.f32 %v2011_v55, %v1092_v54 }
 0x186   : > { %v679_v6 = vpop.f32.mrb[4].mxu1  ;;  %v1098_v9 = vpop.f32.mrb[4].mxu0 }
 0x187   : > { %1128 = vst.msk [vmem:[%s2933_s20 + $0x8] sm:$0xff] %vm1126_vm1, %v2012_v5  ;;  %v2013_v10 = vadd.f32 %v679_v6, %v226_v32  ;;  %v1693_v11 = vpop.f32.mrb[5].mxu1  ;;  %v1852_v17 = vpop.f32.mrb[5].mxu0 }
 0x189   : > { %v2014_v19 = vadd.f32 %v2013_v10, %v1098_v9 }
 0x18a   : > { %v686_v24 = vpop.f32.mrb[6].mxu1  ;;  %v1104_v22 = vpop.f32.mrb[6].mxu0 }
 0x18b   : > { %1129 = vst.msk [vmem:[%s2933_s20 + $0x10] sm:$0xff] %vm1126_vm1, %v2014_v19  ;;  %v2015_v40 = vadd.f32 %v686_v24, %v226_v32  ;;  %v1696_v3 = vpop.f32.mrb[7].mxu1  ;;  %v1855_v62 = vpop.f32.mrb[7].mxu0 }
 0x18d   : > { %v2016_v16 = vadd.f32 %v2015_v40, %v1104_v22 }
 0x18e   : > { %v693_v20 = vpop.f32.mrb[8].mxu1  ;;  %v1110_v35 = vpop.f32.mrb[8].mxu0 }
 0x18f   : > { %1130 = vst.msk [vmem:[%s2933_s20 + $0x18] sm:$0xff] %vm1126_vm1, %v2016_v16  ;;  %v2017_v15 = vadd.f32 %v693_v20, %v226_v32  ;;  %v1699_v60 = vpop.f32.mrb[9].mxu1  ;;  %v1858_v8 = vpop.f32.mrb[9].mxu0 }
 0x191   : > { %v2018_v61 = vadd.f32 %v2017_v15, %v1110_v35 }
 0x192   : > { %v700_v52 = vpop.f32.mrb[10].mxu1  ;;  %v1116_v25 = vpop.f32.mrb[10].mxu0 }
 0x193   : > { %1131 = vst.msk [vmem:[%s2933_s20 + $0x20] sm:$0xff] %vm1126_vm1, %v2018_v61  ;;  %v2019_v39 = vadd.f32 %v700_v52, %v226_v32  ;;  %v1702_v33 = vpop.f32.mrb[11].mxu1  ;;  %v1861_v56 = vpop.f32.mrb[11].mxu0 }
 0x195   : > { %v2020_v37 = vadd.f32 %v2019_v39, %v1116_v25  ;;  %1140 = sbr.rel (!%p2385_p8) target bundleno = 473 (0x1d9), region = 40 }
 0x196   : > { %v707_v2 = vpop.f32.mrb[12].mxu1  ;;  %v1122_v7 = vpop.f32.mrb[12].mxu0 }
 0x197   : > { %1132 = vst.msk [vmem:[%s2933_s20 + $0x28] sm:$0xff] %vm1126_vm1, %v2020_v37  ;;  %v2021_v53 = vadd.f32 %v707_v2, %v226_v32  ;;  %v1705_v28 = vpop.f32.mrb[13].mxu1  ;;  %v1864_v48 = vpop.f32.mrb[13].mxu0 }
 0x199   : > { %v2022_v49 = vadd.f32 %v2021_v53, %v1122_v7 }
 0x19b   : > { %1133 = vst.msk [vmem:[%s2933_s20 + $0x30] sm:$0xff] %vm1126_vm1, %v2022_v49 }
 0x19c   : > { %s3045_s25 = smov (!%p1143_p7, %s1142_s25), 7 }
 0x19d   : > { %s1395_s4 = sshll.u32 %s3045_s25, 7 }
 0x19e   : > { %p1398_p11 = scmp.eq.s32.totalorder %s1395_s4, 0 }
 0x19f   : > { %2184 = sdivrem.u32 (!%p1398_p11), %s3045_s25, 7 }
 0x1a0   : > { %1151 = sbr.rel (%p1398_p11) target bundleno = 473 (0x1d9), region = 44 }
 0x1a8   : > { %s2962_s23 = spop.drf %2184 }
 0x1a9   : > { %p1399_p8 = scmp.le.s32.totalorder %s2962_s23, 0 }
 0x1aa   : > { %s3035_s2 = smov (!%p1399_p8), %s2956_s29  ;;  %s3036_s7 = smov (!%p1399_p8), %s2933_s20 }
 0x1ab   : > { %1339 = sbr.rel (%p1399_p8) target bundleno = 444 (0x1bc), region = 126  ;;  %s2971_s17 = smov (!%p1399_p8), 0  }
 0x1ac   : > { %s2973_s28 = smov (!%p1399_p8), 0  }
 0x1b2 LB: >> { %v1227_v14 = vld [vmem:[%s2290_s7] sm:$0xff]  ;;  %v1229_v43 = vld [vmem:[%s2290_s7 + $0x8] sm:$0xff]  ;;  %v1231_v38 = vld [vmem:[%s2290_s7 + $0x10] sm:$0xff]  ;;  %s1241_s30 = sadd.s32 1, %s2294_s17  ;;  %s1221_s28 = sadd.s32 1, %s2298_s28   ;;  %s2298_s28 = sphi %s2973_s28, %s1221_s28   ;;  %s2294_s17 = sphi %s2971_s17, %s3037_s17   ;;  %s2290_s7 = sphi %s3036_s7, %s1246_s7   ;;  %s2286_s2 = sphi %s3035_s2, %s1247_s2  }
 0x1b3   : >> { %1228 = vst [vmem:[%s2286_s2] sm:$0xff] %v1227_v14  ;;  %1230 = vst [vmem:[%s2286_s2 + $0x8] sm:$0xff] %v1229_v43  ;;  %v1233_v21 = vld [vmem:[%s2290_s7 + $0x18] sm:$0xff]  ;;  %v1235_v26 = vld [vmem:[%s2290_s7 + $0x20] sm:$0xff]  ;;  %p1242_p6 = scmp.ge.s32.totalorder %s1241_s30, %s2962_s23  ;;  %p1220_p9 = scmp.ge.s32.totalorder %s1221_s28, %s2962_s23 }
 0x1b4   : >> { %1232 = vst [vmem:[%s2286_s2 + $0x10] sm:$0xff] %v1231_v38  ;;  %v1237_v27 = vld [vmem:[%s2290_s7 + $0x28] sm:$0xff]  ;;  %1234 = vst [vmem:[%s2286_s2 + $0x18] sm:$0xff] %v1233_v21  ;;  %v1239_v0 = vld [vmem:[%s2290_s7 + $0x30] sm:$0xff] }
 0x1b5   : >> { %1236 = vst [vmem:[%s2286_s2 + $0x20] sm:$0xff] %v1235_v26  ;;  %1238 = vst [vmem:[%s2286_s2 + $0x28] sm:$0xff] %v1237_v27  ;;  %s3047_s30 = smov (%p1242_p6, %s1241_s30), 0  ;;  %1223 = sbr.rel (!%p1220_p9) target bundleno = 434 (0x1b2), region = 132 }
 0x1b6   : >> { %1240 = vst [vmem:[%s2286_s2 + $0x30] sm:$0xff] %v1239_v0  ;;  %s1244_s22 = smul.u32 56, %s3047_s30  ;;  %s3037_s17 = smov %s3047_s30 }
 0x1b8   : >> { %s1246_s7 = scalar_lea.vmem %s2933_s20, %s1244_s22 [#allocation5]   ;;  %s1247_s2 = scalar_lea.vmem %s2956_s29, %s1244_s22  }
 0x1bc PF: > { %2186 = sdivrem.u32 %s3045_s25, 7 }
 0x1bd   : > { %s1400_s6 = smul.u32 56, %s2962_s23 }
 0x1bf   : > { %s1252_s9 = scalar_lea.vmem %s2933_s20, %s1400_s6 [#allocation5]   ;;  %s1254_s10 = scalar_lea.vmem %s2956_s29, %s1400_s6  }
 0x1c5   : > { %s2187_s11 = spop.drf %2186 }
 0x1c6   : > { %p1402_p10 = scmp.le.s32.totalorder %s2187_s11, 0 }
 0x1c7   : > { %s2300_s12 = smov (!%p1402_p10), %s1254_s10   ;;  %s2304_s13 = smov (!%p1402_p10), %s1252_s9  }
 0x1c8   : > { %1353 = sbr.rel (%p1402_p10) target bundleno = 473 (0x1d9), region = 137  ;;  %s2308_s14 = smov (!%p1402_p10), 0  }
 0x1c9   : > { %s2312_s19 = smov (!%p1402_p10), 0  }
 0x1cf LB: >> { %v1264_v46 = vld [vmem:[%s2306_s13] sm:$0xff]  ;;  %s1266_s8 = sadd.s32 1, %s2310_s14  ;;  %s1258_s19 = sadd.s32 1, %s2314_s19   ;;  %s2314_s19 = sphi %s2312_s19, %s1258_s19   ;;  %s2310_s14 = sphi %s2308_s14, %s2309_s14   ;;  %s2306_s13 = sphi %s2304_s13, %s1271_s13   ;;  %s2302_s12 = sphi %s2300_s12, %s1272_s12  }
 0x1d0   : >> { %1265 = vst [vmem:[%s2302_s12] sm:$0xff] %v1264_v46  ;;  %p1267_p12 = scmp.ge.s32.totalorder %s1266_s8, %s2187_s11  ;;  %p1257_p13 = scmp.ge.s32.totalorder %s1258_s19, %s2187_s11 }
 0x1d2   : >> { %s3049_s8 = smov (%p1267_p12, %s1266_s8), 0  ;;  %1260 = sbr.rel (!%p1257_p13) target bundleno = 463 (0x1cf), region = 143 }
 0x1d3   : >> { %s1403_s20 = sshll.u32 %s3049_s8, 3  ;;  %s2309_s14 = smov %s3049_s8  }
 0x1d4   : >> { %s1271_s13 = scalar_lea.vmem %s1252_s9, %s1403_s20 [#allocation5]   ;;  %s1272_s12 = scalar_lea.vmem %s1254_s10, %s1403_s20  }
 0x1d9 PF: > { %p14_p1 = scmp.ge.s32.totalorder %s2367_s18, 6   ;;  %s3038_s14 = smov %s2274_s15 }
 0x1da   : > { %s3039_s15 = smov %s2278_s16  ;;  %s3040_s16 = smov %s2377_s21 }
 0x1db   : > { %s3041_s17 = smov %s2367_s18  ;;  %16 = sbr.rel (!%p14_p1) target bundleno = 5 (0x5), region = 154 }
 0x1e2   :  { %1288 = vsyncpa [#allocation4], 1 }
 0x1e3   :  { %1290 = vsyncpa [#allocation4 + $0x1], 1 }

</bundles_post_ra>
